<compile_context>
chip_gen: v7x
topology: tpu7x:2x2x1
jax: 0.10.0
libtpu: 0.0.40
codegen_flags: <defaults>
</compile_context>

<pallas_src>
import functools

import jax
import jax.numpy as jnp
from jax.experimental import pallas as pl
from jax.experimental.pallas import tpu as pltpu


def _round_up(x, m):
    return ((x + m - 1) // m) * m


# ---------------------------------------------------------------------------
# Kernels
# ---------------------------------------------------------------------------
def _mlp_kernel_depth3(x_ref, w1_ref, w2_ref, w3_ref, o_ref):
    # bf16 operands, f32 MXU accumulation, ReLU on the f32 accumulator.
    h = jnp.dot(x_ref[...], w1_ref[...], preferred_element_type=jnp.float32)
    h = jnp.maximum(h, 0.0).astype(w2_ref.dtype)
    h = jnp.dot(h, w2_ref[...], preferred_element_type=jnp.float32)
    h = jnp.maximum(h, 0.0).astype(w3_ref.dtype)
    out = jnp.dot(h, w3_ref[...], preferred_element_type=jnp.float32)
    o_ref[...] = out.astype(o_ref.dtype)


def _mlp_kernel_depth2(x_ref, w1_ref, w3_ref, o_ref):
    h = jnp.dot(x_ref[...], w1_ref[...], preferred_element_type=jnp.float32)
    h = jnp.maximum(h, 0.0).astype(w3_ref.dtype)
    out = jnp.dot(h, w3_ref[...], preferred_element_type=jnp.float32)
    o_ref[...] = out.astype(o_ref.dtype)


# ---------------------------------------------------------------------------
# Parameter init / one-time prep
# ---------------------------------------------------------------------------
def init_mlp_params(key, *, n_hid, img_size, num_channels, num_classes,
                    dtype=jnp.float32):
    """Synthetic init matching the nn.Linear shapes (bias=False).

    PyTorch stores weights as (out, in); we keep that convention here and
    transpose exactly once in prepare_mlp_params (NOT per forward call).
    """
    d_in = img_size * img_size * num_channels
    k1, k2, k3 = jax.random.split(key, 3)

    def _w(k, fan_out, fan_in):
        scale = 1.0 / jnp.sqrt(jnp.float32(fan_in))
        return (jax.random.uniform(k, (fan_out, fan_in), jnp.float32,
                                   minval=-1.0, maxval=1.0) * scale).astype(dtype)

    return {
        "input_layer":  _w(k1, n_hid, d_in),
        "hidden_layer": _w(k2, n_hid, n_hid),
        "output_layer": _w(k3, num_classes, n_hid),
    }


def prepare_mlp_params(params, *, compute_dtype=jnp.bfloat16,
                       hid_align=256, lane_align=128):
    """One-time weight prep: transpose to (in, out), zero-pad to MXU/lane
    friendly shapes, cast to bf16.  Zero padding keeps the math exact for the
    real rows/columns (relu(0) = 0, 0 @ W = 0)."""
    w1 = params["input_layer"].T      # (d_in, n_hid)
    w2 = params["hidden_layer"].T     # (n_hid, n_hid)
    w3 = params["output_layer"].T     # (n_hid, num_classes)
    d_in, n_hid = w1.shape
    num_classes = w3.shape[1]

    d_pad = _round_up(d_in, lane_align)
    h_pad = _round_up(n_hid, hid_align)
    c_pad = _round_up(num_classes, lane_align)

    w1p = jnp.pad(w1.astype(compute_dtype),
                  ((0, d_pad - d_in), (0, h_pad - n_hid)))
    w2p = jnp.pad(w2.astype(compute_dtype),
                  ((0, h_pad - n_hid), (0, h_pad - n_hid)))
    w3p = jnp.pad(w3.astype(compute_dtype),
                  ((0, h_pad - n_hid), (0, c_pad - num_classes)))
    return {"w1": w1p, "w2": w2p, "w3": w3p,
            "num_classes": num_classes, "d_in": d_in}


# ---------------------------------------------------------------------------
# Forward pass
# ---------------------------------------------------------------------------
def _vmem_plan_bytes(tile_b, d_pad, h_pad, c_pad, itemsize, w_bytes):
    # 2x activation tiles + 2x output tiles (pipeline double buffers)
    # + weights (x2 headroom for the pipeline's buffer allocation)
    # + f32 hidden intermediates headroom.
    return (2 * tile_b * d_pad * itemsize
            + 2 * tile_b * c_pad * 4
            + 2 * w_bytes
            + 2 * tile_b * h_pad * 4)


@functools.partial(jax.jit, static_argnames=("num_classes", "depth"))
def mlp_forward(x, w1, w2, w3, *, num_classes, depth=3):
    """x: (B, C, H, W) -> logits (B, num_classes), same dtype as x."""
    B = x.shape[0]
    x2d = x.reshape(B, -1)                      # == torch x.view(B, -1)
    d_in = x2d.shape[1]

    compute_dtype = w1.dtype
    itemsize = jnp.dtype(compute_dtype).itemsize
    d_pad, h_pad = w1.shape
    c_pad = w3.shape[1]
    w_bytes = (w1.size + (w2.size if depth != 2 else 0) + w3.size) * itemsize

    # Batch tile: as large as fits comfortably in VMEM (amortizes per-step
    # overhead); tiny batches only pad up to a sublane multiple.
    vmem_budget = 48 << 20                      # leaves headroom on v7x 64 MiB
    tile_b = min(512, _round_up(B, 8))
    while (tile_b > 8 and
           _vmem_plan_bytes(tile_b, d_pad, h_pad, c_pad, itemsize, w_bytes)
           > vmem_budget):
        tile_b = max(8, _round_up(tile_b // 2, 8))
    b_pad = _round_up(B, tile_b)
    grid = (b_pad // tile_b,)

    # Single fused pad+cast; skipped entirely when already aligned.
    x2d = x2d.astype(compute_dtype)
    if b_pad != B or d_pad != d_in:
        x_pad = jnp.pad(x2d, ((0, b_pad - B), (0, d_pad - d_in)))
    else:
        x_pad = x2d

    x_spec = pl.BlockSpec((tile_b, d_pad), lambda i: (i, 0))
    w_spec = lambda shape: pl.BlockSpec(shape, lambda i: (0, 0))   # resident
    out_spec = pl.BlockSpec((tile_b, c_pad), lambda i: (i, 0))
    out_shape = jax.ShapeDtypeStruct((b_pad, c_pad), jnp.float32)

    flops_per_row = 2 * (d_pad * h_pad
                         + (h_pad * h_pad if depth != 2 else 0)
                         + h_pad * c_pad)
    cost = pl.CostEstimate(
        flops=b_pad * flops_per_row,
        transcendentals=0,
        bytes_accessed=b_pad * d_pad * itemsize + w_bytes + b_pad * c_pad * 4)

    vmem_bytes = _vmem_plan_bytes(tile_b, d_pad, h_pad, c_pad, itemsize,
                                  w_bytes)
    vmem_limit = int(min(56 << 20, max(32 << 20, vmem_bytes * 5 // 4)))

    cparams = pltpu.CompilerParams(
        dimension_semantics=("parallel",),      # megacore sharding on v7x
        vmem_limit_bytes=vmem_limit)

    if depth != 2:
        out_pad = pl.pallas_call(
            _mlp_kernel_depth3,
            out_shape=out_shape,
            grid=grid,
            in_specs=[x_spec, w_spec(w1.shape), w_spec(w2.shape),
                      w_spec(w3.shape)],
            out_specs=out_spec,
            compiler_params=cparams,
            cost_estimate=cost,
        )(x_pad, w1, w2, w3)
    else:
        out_pad = pl.pallas_call(
            _mlp_kernel_depth2,
            out_shape=out_shape,
            grid=grid,
            in_specs=[x_spec, w_spec(w1.shape), w_spec(w3.shape)],
            out_specs=out_spec,
            compiler_params=cparams,
            cost_estimate=cost,
        )(x_pad, w1, w3)

    return out_pad[:B, :num_classes].astype(x.dtype)


# ---------------------------------------------------------------------------
# Reference + self-test
# ---------------------------------------------------------------------------
def _reference_forward(x, params, *, depth=3, compute_dtype=jnp.bfloat16):
    """Pure-JAX reference with the same bf16-operand / f32-accum recipe."""
    x2d = x.reshape(x.shape[0], -1).astype(compute_dtype)
    w1 = params["input_layer"].T.astype(compute_dtype)
    w2 = params["hidden_layer"].T.astype(compute_dtype)
    w3 = params["output_layer"].T.astype(compute_dtype)
    h = jnp.maximum(jnp.dot(x2d, w1, preferred_element_type=jnp.float32), 0.0)
    if depth != 2:
        h = jnp.maximum(jnp.dot(h.astype(compute_dtype), w2,
                                preferred_element_type=jnp.float32), 0.0)
    return jnp.dot(h.astype(compute_dtype), w3,
                   preferred_element_type=jnp.float32)


if __name__ == "__main__":
    # Small, module-consistent shapes: batch=2, channels=1, img_size=16,
    # n_hid=32, num_classes=10.
    B, C, S = 2, 1, 16
    N_HID, N_CLS = 32, 10

    key = jax.random.PRNGKey(0)
    kx, kp = jax.random.split(key)

    x = jax.random.normal(kx, (B, C, S, S), jnp.float32)
    params = init_mlp_params(kp, n_hid=N_HID, img_size=S,
                             num_channels=C, num_classes=N_CLS)
    prep = prepare_mlp_params(params)          # one-time transpose/pad/bf16

    ok = True
    for depth in (3, 2):
        out = mlp_forward(x, prep["w1"], prep["w2"], prep["w3"],
                          num_classes=N_CLS, depth=depth)
        out = jax.block_until_ready(out)
        ref = _reference_forward(x, params, depth=depth).astype(out.dtype)
        ok &= out.shape == (B, N_CLS)
        ok &= bool(jnp.allclose(out, ref, atol=2e-2, rtol=2e-2))

    assert ok, "mismatch vs reference"
    print("KERNEL_OK")
</pallas_src>

<mosaic_0001>
module attributes {stable_mosaic.version = 11 : i64} {
  func.func @_mlp_kernel_depth3(%arg0: i32, %arg1: memref<8x256xbf16, #tpu.memory_space<vmem>>, %arg2: memref<256x256xbf16, #tpu.memory_space<vmem>>, %arg3: memref<256x256xbf16, #tpu.memory_space<vmem>>, %arg4: memref<256x128xbf16, #tpu.memory_space<vmem>>, %arg5: memref<8x128xf32, #tpu.memory_space<vmem>>) attributes {dimension_semantics = [#tpu.dimension_semantics<parallel>], iteration_bounds = array<i64: 1>, scalar_prefetch = 0 : i64, scratch_operands = 0 : i64, tpu.core_type = #tpu.core_type<tc>, window_params = [{transform_indices = @transform_0, window_bounds = array<i64: 8, 256>}, {pipeline_mode = #tpu.pipeline_mode<synchronous>, transform_indices = @transform_1, window_bounds = array<i64: 256, 256>}, {pipeline_mode = #tpu.pipeline_mode<synchronous>, transform_indices = @transform_2, window_bounds = array<i64: 256, 256>}, {pipeline_mode = #tpu.pipeline_mode<synchronous>, transform_indices = @transform_3, window_bounds = array<i64: 256, 128>}, {transform_indices = @transform_4, window_bounds = array<i64: 8, 128>}]} {
    %c0 = arith.constant 0 : index
    %c0_0 = arith.constant 0 : index
    %0 = vector.load %arg1[%c0, %c0_0] : memref<8x256xbf16, #tpu.memory_space<vmem>>, vector<8x256xbf16>
    %c0_1 = arith.constant 0 : index
    %c0_2 = arith.constant 0 : index
    %1 = vector.load %arg2[%c0_1, %c0_2] : memref<256x256xbf16, #tpu.memory_space<vmem>>, vector<256x256xbf16>
    %cst = arith.constant dense<0.000000e+00> : vector<8x256xf32>
    %2 = tpu.matmul %0, %1, %cst {dimension_numbers = #tpu.dot_dimension_numbers<[1], [0], [0], [1], [0, 0, 1, 1], [], []>} : vector<8x256xbf16>, vector<256x256xbf16>, vector<8x256xf32> -> vector<8x256xf32>
    %cst_3 = arith.constant 0.000000e+00 : f32
    %3 = vector.broadcast %cst_3 : f32 to vector<8x256xf32>
    %4 = arith.maximumf %2, %3 : vector<8x256xf32>
    %5 = arith.truncf %4 : vector<8x256xf32> to vector<8x256xbf16>
    %c0_4 = arith.constant 0 : index
    %c0_5 = arith.constant 0 : index
    %6 = vector.load %arg3[%c0_4, %c0_5] : memref<256x256xbf16, #tpu.memory_space<vmem>>, vector<256x256xbf16>
    %cst_6 = arith.constant dense<0.000000e+00> : vector<8x256xf32>
    %7 = tpu.matmul %5, %6, %cst_6 {dimension_numbers = #tpu.dot_dimension_numbers<[1], [0], [0], [1], [0, 0, 1, 1], [], []>} : vector<8x256xbf16>, vector<256x256xbf16>, vector<8x256xf32> -> vector<8x256xf32>
    %cst_7 = arith.constant 0.000000e+00 : f32
    %8 = vector.broadcast %cst_7 : f32 to vector<8x256xf32>
    %9 = arith.maximumf %7, %8 : vector<8x256xf32>
    %10 = arith.truncf %9 : vector<8x256xf32> to vector<8x256xbf16>
    %c0_8 = arith.constant 0 : index
    %c0_9 = arith.constant 0 : index
    %11 = vector.load %arg4[%c0_8, %c0_9] : memref<256x128xbf16, #tpu.memory_space<vmem>>, vector<256x128xbf16>
    %cst_10 = arith.constant dense<0.000000e+00> : vector<8x128xf32>
    %12 = tpu.matmul %10, %11, %cst_10 {dimension_numbers = #tpu.dot_dimension_numbers<[1], [0], [0], [1], [0, 0, 1, 1], [], []>} : vector<8x256xbf16>, vector<256x128xbf16>, vector<8x128xf32> -> vector<8x128xf32>
    %c0_11 = arith.constant 0 : index
    %c0_12 = arith.constant 0 : index
    %13 = vector.load %arg5[%c0_11, %c0_12] : memref<8x128xf32, #tpu.memory_space<vmem>>, vector<8x128xf32>
    tpu.vector_store %arg5[%c0_11, %c0_12], %12 {strides = array<i32>} : memref<8x128xf32, #tpu.memory_space<vmem>>, vector<8x128xf32>,
    return
  }
  func.func @transform_0(%arg0: i32) -> (i32, i32) {
    %c0_i32 = arith.constant 0 : i32
    %c0_i32_0 = arith.constant 0 : i32
    return %arg0, %c0_i32 : i32, i32
  }
  func.func @transform_1(%arg0: i32) -> (i32, i32) {
    %c0_i32 = arith.constant 0 : i32
    %c0_i32_0 = arith.constant 0 : i32
    %c0_i32_1 = arith.constant 0 : i32
    return %c0_i32, %c0_i32_0 : i32, i32
  }
  func.func @transform_2(%arg0: i32) -> (i32, i32) {
    %c0_i32 = arith.constant 0 : i32
    %c0_i32_0 = arith.constant 0 : i32
    %c0_i32_1 = arith.constant 0 : i32
    return %c0_i32, %c0_i32_0 : i32, i32
  }
  func.func @transform_3(%arg0: i32) -> (i32, i32) {
    %c0_i32 = arith.constant 0 : i32
    %c0_i32_0 = arith.constant 0 : i32
    %c0_i32_1 = arith.constant 0 : i32
    return %c0_i32, %c0_i32_0 : i32, i32
  }
  func.func @transform_4(%arg0: i32) -> (i32, i32) {
    %c0_i32 = arith.constant 0 : i32
    %c0_i32_0 = arith.constant 0 : i32
    return %arg0, %c0_i32 : i32, i32
  }
}

</mosaic_0001>

<bundles_post_ra>
// kernel: mlp_forward.1
= control target key start
LH: loop header
LB: loop body
LE: loop exit
PB: predicated region body
PF: predicated region fallthrough
CT: control target
= control target key end

     0   :  { %9 = vsyncpa [#allocation3], 0  ;;  %s1098_s0 = inlined_call_operand.vmem [shape: bf16[8,256], index: 0, kind: input, shape index: {}]   ;;  %s1099_s1 = inlined_call_operand.hbm [shape: bf16[256,256], index: 1, kind: input, shape index: {}]   ;;  %s1100_s2 = inlined_call_operand.hbm [shape: bf16[256,256], index: 2, kind: input, shape index: {}]   ;;  %s1101_s3 = inlined_call_operand.hbm [shape: bf16[256,128], index: 3, kind: input, shape index: {}]   ;;  %s1102_s4 = inlined_call_operand.vmem [shape: f32[8,128], index: 4, kind: output, shape index: {}]  }
   0x1   :  { %10 = vsyncpa [#allocation5], 0  ;;  %s1011_s15 = smov [#allocation4]   ;;  %s1012_s17 = smov [#allocation2]  }
   0x2   :  { %s30_s16 = sshll.u32 %s1011_s15, 4  ;;  %s18_s18 = sshll.u32 %s1012_s17, 4  ;;  %s31_s16 = int_to_ptr.vmem [resolvable:$true] %s30_s16  ;;  %s1043_s18 = int_to_ptr.vmem [resolvable:$true] %s18_s18 }
   0x3   :  { %s941_s21 = scalar_lea.hbm %s1100_s2, 4096 }
   0x4   :  { %p942_p0 = scmp.ne.s32.totalorder %s1100_s2, %s941_s21  ;;  %p945_p1 = scmp.lt.u32.totalorder %s941_s21, %s1100_s2 }
   0x6   :  { %p947_p2 = pnand %p945_p1, %p942_p0 }
   0x8   :  { %950 = shalt.err (!%p947_p2)
}
   0x9   :  { %s951_s26 = scalar_lea.vmem %s31_s16, 4096  ;;  %p956_p4 = scmp.lt.s32.totalorder %s31_s16, %s31_s16 }
   0xa   :  { %p952_p3 = scmp.ne.s32.totalorder %s31_s16, %s951_s26  ;;  %p957_p5 = scmp.lt.s32.totalorder %s951_s26, %s951_s26 }
   0xc   :  { %p958_p6 = por %p957_p5, %p956_p4 }
   0xe   :  { %p959_p7 = pnand %p958_p6, %p952_p3 }
  0x10   :  { %962 = shalt.err (!%p959_p7)
}
  0x11   :  { %s1013_s27 = smov 128   ;;  %s1014_s28 = smov 8  }
  0x12   :  { %36 = dma.hbm_to_vmem [thread:$0]  %s1100_s2, 4096, %s31_s16, [#allocation5], %s1013_s27, %s1013_s27, %s1014_s28  }
  0x13   :  { %s963_s7 = scalar_lea.hbm %s1099_s1, 4096 }
  0x14   :  { %p964_p8 = scmp.ne.s32.totalorder %s1099_s1, %s963_s7  ;;  %p967_p9 = scmp.lt.u32.totalorder %s963_s7, %s1099_s1 }
  0x16   :  { %p969_p10 = pnand %p967_p9, %p964_p8 }
  0x18   :  { %972 = shalt.err (!%p969_p10)
}
  0x19   :  { %s973_s12 = scalar_lea.vmem %s1043_s18, 4096  ;;  %p978_p12 = scmp.lt.s32.totalorder %s1043_s18, %s1043_s18 }
  0x1a   :  { %p974_p11 = scmp.ne.s32.totalorder %s1043_s18, %s973_s12  ;;  %p979_p13 = scmp.lt.s32.totalorder %s973_s12, %s973_s12 }
  0x1c   :  { %p980_p0 = por %p979_p13, %p978_p12 }
  0x1e   :  { %p981_p1 = pnand %p980_p0, %p974_p11 }
  0x20   :  { %984 = shalt.err (!%p981_p1)
}
  0x21   :  { %24 = dma.hbm_to_vmem [thread:$0]  %s1099_s1, 4096, %s1043_s18, [#allocation3], %s1013_s27, %s1013_s27, %s1014_s28  }
  0x22   :  { %s1015_s14 = smov [#allocation6]   ;;  %s985_s19 = scalar_lea.hbm %s1101_s3, 2048 }
  0x23   :  { %s42_s15 = sshll.u32 %s1015_s14, 4  ;;  %p986_p2 = scmp.ne.s32.totalorder %s1101_s3, %s985_s19  ;;  %s43_s15 = int_to_ptr.vmem [resolvable:$true] %s42_s15 }
  0x24   :  { %p989_p3 = scmp.lt.u32.totalorder %s985_s19, %s1101_s3 }
  0x26   :  { %p991_p4 = pnand %p989_p3, %p986_p2 }
  0x28   :  { %994 = shalt.err (!%p991_p4)
}
  0x29   :  { %s995_s24 = scalar_lea.vmem %s43_s15, 2048  ;;  %p1000_p6 = scmp.lt.s32.totalorder %s43_s15, %s43_s15 }
  0x2a   :  { %p996_p5 = scmp.ne.s32.totalorder %s43_s15, %s995_s24  ;;  %p1001_p7 = scmp.lt.s32.totalorder %s995_s24, %s995_s24 }
  0x2c   :  { %p1002_p8 = por %p1001_p7, %p1000_p6 }
  0x2e   :  { %p1003_p9 = pnand %p1002_p8, %p996_p5 }
  0x30   :  { %1006 = shalt.err (!%p1003_p9)
}
  0x31   :  { %s1016_s1 = smov 64   ;;  %s1017_s18 = smov 4  }
  0x32   :  { %48 = dma.hbm_to_vmem [thread:$0]  %s1101_s3, 2048, %s43_s15, [#allocation5], %s1016_s1, %s1016_s1, %s1017_s18  }
  0x33   :  { %1007 = dma.done.wait [#allocation3], 4096  }
  0x34   :  { %1008 = vsyncadd [#allocation3], 4294963200 }
  0x35   :  { %1009 = dma.done.wait [#allocation5], 6144  }
  0x36   :  { %1010 = vsyncadd [#allocation5], 4294961152  ;;  %v827_v0 = vld [vmem:[#allocation2 + $0x4] ss:$8 sps:$4 sm:$0xff]   ;;  %v829_v1 = vld [vmem:[#allocation2] ss:$8 sps:$4 sm:$0xff]  }
  0x37   :  { %259 = vmatprep.subr.bf16.mxu0 %v827_v0  ;;  %v830_v2 = vld [vmem:[#allocation2 + $0x14] ss:$8 sps:$4 sm:$0xff]   ;;  %v832_v3 = vld [vmem:[#allocation2 + $0x10] ss:$8 sps:$4 sm:$0xff]   ;;  %v833_v4 = vld [vmem:[#allocation2 + $0x24] ss:$8 sps:$4 sm:$0xff]  }
  0x38   :  { %260 = vmatpush1.bf16.msra.mxu0 %v829_v1  ;;  %v835_v5 = vld [vmem:[#allocation2 + $0x20] ss:$8 sps:$4 sm:$0xff]   ;;  %v836_v6 = vld [vmem:[#allocation2 + $0x34] ss:$8 sps:$4 sm:$0xff]   ;;  %v838_v7 = vld [vmem:[#allocation2 + $0x30] ss:$8 sps:$4 sm:$0xff]  }
  0x39   :  { %261 = vmatprep.subr.bf16.mxu0 %v830_v2  ;;  %v839_v8 = vld [vmem:[#allocation2 + $0x44] ss:$8 sps:$4 sm:$0xff]   ;;  %v841_v9 = vld [vmem:[#allocation2 + $0x40] ss:$8 sps:$4 sm:$0xff]   ;;  %v842_v10 = vld [vmem:[#allocation2 + $0x54] ss:$8 sps:$4 sm:$0xff]  }
  0x3a   :  { %v844_v11 = vld [vmem:[#allocation2 + $0x50] ss:$8 sps:$4 sm:$0xff]   ;;  %v845_v12 = vld [vmem:[#allocation2 + $0x64] ss:$8 sps:$4 sm:$0xff]   ;;  %v847_v13 = vld [vmem:[#allocation2 + $0x60] ss:$8 sps:$4 sm:$0xff]  }
  0x3b   :  { %v1089_v14 = vld [vmem:[%s1098_s0] sm:$0xff]  ;;  %v880_v18 = vld [vmem:[#allocation4 + $0x14] ss:$8 sps:$4 sm:$0xff]   ;;  %v850_v20 = vld [vmem:[#allocation2 + $0x70] ss:$8 sps:$4 sm:$0xff]  }
  0x3c   :  { %262 = vmatpush1.bf16.msra.mxu0 %v832_v3  ;;  %v717_v15 = vcombine.high %v1089_v14, %v1089_v14  ;;  %v877_v16 = vld [vmem:[#allocation4 + $0x4] ss:$8 sps:$4 sm:$0xff]   ;;  %v879_v17 = vld [vmem:[#allocation4] ss:$8 sps:$4 sm:$0xff]   ;;  %v848_v19 = vld [vmem:[#allocation2 + $0x74] ss:$8 sps:$4 sm:$0xff]   ;;  %v716_v55 = vcombine.low %v1089_v14, %v1089_v14 }
  0x3d   :  { %263 = vmatprep.subr.bf16.mxu0 %v833_v4  ;;  %496 = vmatprep.subr.bf16.mxu1 %v877_v16  ;;  %v882_v21 = vld [vmem:[#allocation4 + $0x10] ss:$8 sps:$4 sm:$0xff]   ;;  %v883_v22 = vld [vmem:[#allocation4 + $0x24] ss:$8 sps:$4 sm:$0xff]   ;;  %v853_v24 = vld [vmem:[#allocation2 + $0x80] ss:$8 sps:$4 sm:$0xff]  }
  0x3e   :  { %291 = vmatprep.mubr.bf16.mxu0 %v717_v15  ;;  %497 = vmatpush1.bf16.msra.mxu1 %v879_v17  ;;  %v851_v23 = vld [vmem:[#allocation2 + $0x84] ss:$8 sps:$4 sm:$0xff]   ;;  %v885_v25 = vld [vmem:[#allocation4 + $0x20] ss:$8 sps:$4 sm:$0xff]   ;;  %v886_v26 = vld [vmem:[#allocation4 + $0x34] ss:$8 sps:$4 sm:$0xff]  }
  0x3f   :  { %498 = vmatprep.subr.bf16.mxu1 %v880_v18  ;;  %v854_v27 = vld [vmem:[#allocation2 + $0x94] ss:$8 sps:$4 sm:$0xff]   ;;  %v856_v28 = vld [vmem:[#allocation2 + $0x90] ss:$8 sps:$4 sm:$0xff]   ;;  %v889_v30 = vld [vmem:[#allocation4 + $0x44] ss:$8 sps:$4 sm:$0xff]  }
  0x40   :  { %264 = vmatpush1.bf16.msra.mxu0 %v835_v5  ;;  %v888_v29 = vld [vmem:[#allocation4 + $0x30] ss:$8 sps:$4 sm:$0xff]   ;;  %v857_v31 = vld [vmem:[#allocation2 + $0xa4] ss:$8 sps:$4 sm:$0xff]   ;;  %v859_v32 = vld [vmem:[#allocation2 + $0xa0] ss:$8 sps:$4 sm:$0xff]  }
  0x41   :  { %265 = vmatprep.subr.bf16.mxu0 %v836_v6  ;;  %v860_v33 = vld [vmem:[#allocation2 + $0xb4] ss:$8 sps:$4 sm:$0xff]   ;;  %v891_v34 = vld [vmem:[#allocation4 + $0x40] ss:$8 sps:$4 sm:$0xff]   ;;  %v894_v36 = vld [vmem:[#allocation4 + $0x50] ss:$8 sps:$4 sm:$0xff]  }
  0x42   :  { %499 = vmatpush1.bf16.msra.mxu1 %v882_v21  ;;  %v892_v35 = vld [vmem:[#allocation4 + $0x54] ss:$8 sps:$4 sm:$0xff]   ;;  %v862_v37 = vld [vmem:[#allocation2 + $0xb0] ss:$8 sps:$4 sm:$0xff]   ;;  %v895_v38 = vld [vmem:[#allocation4 + $0x64] ss:$8 sps:$4 sm:$0xff]  }
  0x43   :  { %500 = vmatprep.subr.bf16.mxu1 %v883_v22  ;;  %v863_v39 = vld [vmem:[#allocation2 + $0xc4] ss:$8 sps:$4 sm:$0xff]   ;;  %v897_v40 = vld [vmem:[#allocation4 + $0x60] ss:$8 sps:$4 sm:$0xff]   ;;  %v898_v42 = vld [vmem:[#allocation4 + $0x74] ss:$8 sps:$4 sm:$0xff]  }
  0x44   :  { %266 = vmatpush1.bf16.msra.mxu0 %v838_v7  ;;  %v865_v41 = vld [vmem:[#allocation2 + $0xc0] ss:$8 sps:$4 sm:$0xff]   ;;  %v866_v43 = vld [vmem:[#allocation2 + $0xd4] ss:$8 sps:$4 sm:$0xff]   ;;  %v900_v44 = vld [vmem:[#allocation4 + $0x70] ss:$8 sps:$4 sm:$0xff]  }
  0x45   :  { %267 = vmatprep.subr.bf16.mxu0 %v839_v8  ;;  %v868_v45 = vld [vmem:[#allocation2 + $0xd0] ss:$8 sps:$4 sm:$0xff]   ;;  %v901_v46 = vld [vmem:[#allocation4 + $0x84] ss:$8 sps:$4 sm:$0xff]   ;;  %v903_v48 = vld [vmem:[#allocation4 + $0x80] ss:$8 sps:$4 sm:$0xff]  }
  0x46   :  { %501 = vmatpush1.bf16.msra.mxu1 %v885_v25  ;;  %v869_v47 = vld [vmem:[#allocation2 + $0xe4] ss:$8 sps:$4 sm:$0xff]   ;;  %v871_v49 = vld [vmem:[#allocation2 + $0xe0] ss:$8 sps:$4 sm:$0xff]   ;;  %v904_v50 = vld [vmem:[#allocation4 + $0x94] ss:$8 sps:$4 sm:$0xff]  }
  0x47   :  { %502 = vmatprep.subr.bf16.mxu1 %v886_v26  ;;  %v872_v51 = vld [vmem:[#allocation2 + $0xf4] ss:$8 sps:$4 sm:$0xff]   ;;  %v906_v52 = vld [vmem:[#allocation4 + $0x90] ss:$8 sps:$4 sm:$0xff]   ;;  %v907_v54 = vld [vmem:[#allocation4 + $0xa4] ss:$8 sps:$4 sm:$0xff]  }
  0x48   :  { %268 = vmatpush1.bf16.msra.mxu0 %v841_v9  ;;  %v874_v53 = vld [vmem:[#allocation2 + $0xf0] ss:$8 sps:$4 sm:$0xff]   ;;  %v909_v56 = vld [vmem:[#allocation4 + $0xa0] ss:$8 sps:$4 sm:$0xff]   ;;  %v910_v57 = vld [vmem:[#allocation4 + $0xb4] ss:$8 sps:$4 sm:$0xff]  }
  0x49   :  { %269 = vmatprep.subr.bf16.mxu0 %v842_v10  ;;  %v912_v58 = vld [vmem:[#allocation4 + $0xb0] ss:$8 sps:$4 sm:$0xff]   ;;  %v913_v59 = vld [vmem:[#allocation4 + $0xc4] ss:$8 sps:$4 sm:$0xff]   ;;  %v915_v60 = vld [vmem:[#allocation4 + $0xc0] ss:$8 sps:$4 sm:$0xff]  }
  0x4a   :  { %503 = vmatpush1.bf16.msra.mxu1 %v888_v29  ;;  %v916_v61 = vld [vmem:[#allocation4 + $0xd4] ss:$8 sps:$4 sm:$0xff]   ;;  %v918_v62 = vld [vmem:[#allocation4 + $0xd0] ss:$8 sps:$4 sm:$0xff]   ;;  %v919_v63 = vld [vmem:[#allocation4 + $0xe4] ss:$8 sps:$4 sm:$0xff]  }
  0x4b   :  { %504 = vmatprep.subr.bf16.mxu1 %v889_v30  ;;  %v921_v0 = vld [vmem:[#allocation4 + $0xe0] ss:$8 sps:$4 sm:$0xff]   ;;  %v922_v1 = vld [vmem:[#allocation4 + $0xf4] ss:$8 sps:$4 sm:$0xff]   ;;  %v924_v2 = vld [vmem:[#allocation4 + $0xf0] ss:$8 sps:$4 sm:$0xff]  }
  0x4c   :  { %270 = vmatpush1.bf16.msra.mxu0 %v844_v11  ;;  %v925_v3 = vld [vmem:[#allocation6 + $0x40] sm:$0xff]   ;;  %v927_v5 = vld [vmem:[#allocation6 + $0x48] sm:$0xff]   ;;  %v929_v7 = vld [vmem:[#allocation6 + $0x50] sm:$0xff]  }
  0x4d   :  { %271 = vmatprep.subr.bf16.mxu0 %v845_v12  ;;  %v926_v4 = vld [vmem:[#allocation6] sm:$0xff]   ;;  %v928_v6 = vld [vmem:[#allocation6 + $0x8] sm:$0xff]   ;;  %v930_v8 = vld [vmem:[#allocation6 + $0x10] sm:$0xff]  }
  0x4e   :  { %505 = vmatpush1.bf16.msra.mxu1 %v891_v34  ;;  %v931_v9 = vld [vmem:[#allocation6 + $0x58] sm:$0xff]   ;;  %v933_v11 = vld [vmem:[#allocation6 + $0x60] sm:$0xff]   ;;  %v936_v14 = vld [vmem:[#allocation6 + $0x28] sm:$0xff]  }
  0x4f   :  { %506 = vmatprep.subr.bf16.mxu1 %v892_v35  ;;  %v932_v10 = vld [vmem:[#allocation6 + $0x18] sm:$0xff]   ;;  %v934_v12 = vld [vmem:[#allocation6 + $0x20] sm:$0xff]   ;;  %v937_v15 = vld [vmem:[#allocation6 + $0x70] sm:$0xff]  }
  0x50   :  { %272 = vmatpush1.bf16.msra.mxu0 %v847_v13  ;;  %v935_v13 = vld [vmem:[#allocation6 + $0x68] sm:$0xff]   ;;  %v939_v25 = vld [vmem:[#allocation6 + $0x78] sm:$0xff]  }
  0x51   :  { %273 = vmatprep.subr.bf16.mxu0 %v848_v19  ;;  %v940_v26 = vld [vmem:[#allocation6 + $0x38] sm:$0xff]  }
  0x52   :  { %507 = vmatpush1.bf16.msra.mxu1 %v894_v36 }
  0x53   :  { %508 = vmatprep.subr.bf16.mxu1 %v895_v38 }
  0x54   :  { %274 = vmatpush1.bf16.msra.mxu0 %v850_v20 }
  0x55   :  { %275 = vmatprep.subr.bf16.mxu0 %v851_v23 }
  0x56   :  { %509 = vmatpush1.bf16.msra.mxu1 %v897_v40 }
  0x57   :  { %510 = vmatprep.subr.bf16.mxu1 %v898_v42 }
  0x58   :  { %276 = vmatpush1.bf16.msra.mxu0 %v853_v24  ;;  %v938_v24 = vld [vmem:[#allocation6 + $0x30] sm:$0xff]  }
  0x59   :  { %277 = vmatprep.subr.bf16.mxu0 %v854_v27 }
  0x5a   :  { %511 = vmatpush1.bf16.msra.mxu1 %v900_v44 }
  0x5b   :  { %512 = vmatprep.subr.bf16.mxu1 %v901_v46 }
  0x5c   :  { %278 = vmatpush1.bf16.msra.mxu0 %v856_v28 }
  0x5d   :  { %279 = vmatprep.subr.bf16.mxu0 %v857_v31 }
  0x5e   :  { %513 = vmatpush1.bf16.msra.mxu1 %v903_v48 }
  0x5f   :  { %514 = vmatprep.subr.bf16.mxu1 %v904_v50 }
  0x60   :  { %280 = vmatpush1.bf16.msra.mxu0 %v859_v32 }
  0x61   :  { %281 = vmatprep.subr.bf16.mxu0 %v860_v33 }
  0x62   :  { %515 = vmatpush1.bf16.msra.mxu1 %v906_v52 }
  0x63   :  { %516 = vmatprep.subr.bf16.mxu1 %v907_v54 }
  0x64   :  { %282 = vmatpush1.bf16.msra.mxu0 %v862_v37 }
  0x65   :  { %283 = vmatprep.subr.bf16.mxu0 %v863_v39 }
  0x66   :  { %517 = vmatpush1.bf16.msra.mxu1 %v909_v56 }
  0x67   :  { %518 = vmatprep.subr.bf16.mxu1 %v910_v57 }
  0x68   :  { %284 = vmatpush1.bf16.msra.mxu0 %v865_v41 }
  0x69   :  { %285 = vmatprep.subr.bf16.mxu0 %v866_v43 }
  0x6a   :  { %519 = vmatpush1.bf16.msra.mxu1 %v912_v58 }
  0x6b   :  { %520 = vmatprep.subr.bf16.mxu1 %v913_v59 }
  0x6c   :  { %286 = vmatpush1.bf16.msra.mxu0 %v868_v45 }
  0x6d   :  { %287 = vmatprep.subr.bf16.mxu0 %v869_v47 }
  0x6e   :  { %521 = vmatpush1.bf16.msra.mxu1 %v915_v60 }
  0x6f   :  { %522 = vmatprep.subr.bf16.mxu1 %v916_v61 }
  0x70   :  { %288 = vmatpush1.bf16.msra.mxu0 %v871_v49 }
  0x71   :  { %289 = vmatprep.subr.bf16.mxu0 %v872_v51 }
  0x72   :  { %523 = vmatpush1.bf16.msra.mxu1 %v918_v62 }
  0x73   :  { %524 = vmatprep.subr.bf16.mxu1 %v919_v63 }
  0x74   :  { %290 = vmatpush1.bf16.msra.mxu0 %v874_v53 }
  0x75   :  { %798 = vmatprep.subr.bf16.mxu0 %v925_v3 }
  0x76   :  { %525 = vmatpush1.bf16.msra.mxu1 %v921_v0 }
  0x77   :  { %292 = vmatmul.mubr.bf16.vlgmr.msra.gmra.mrb[0].mxu0 %v716_v55  ;;  %526 = vmatprep.subr.bf16.mxu1 %v922_v1 }
  0x78   :  { %799 = vmatpush3.bf16.msra.mxu0 %v926_v4 }
  0x79   :  { %800 = vmatprep.subr.bf16.mxu0 %v927_v5 }
  0x7a   :  { %527 = vmatpush1.bf16.msra.mxu1 %v924_v2 }
  0x7c   :  { %801 = vmatpush3.bf16.msra.mxu0 %v928_v6 }
  0x7d   :  { %802 = vmatprep.subr.bf16.mxu0 %v929_v7 }
  0x80   :  { %803 = vmatpush3.bf16.msra.mxu0 %v930_v8 }
  0x81   :  { %804 = vmatprep.subr.bf16.mxu0 %v931_v9 }
  0x84   :  { %805 = vmatpush3.bf16.msra.mxu0 %v932_v10 }
  0x85   :  { %806 = vmatprep.subr.bf16.mxu0 %v933_v11 }
  0x88   :  { %807 = vmatpush3.bf16.msra.mxu0 %v934_v12 }
  0x89   :  { %808 = vmatprep.subr.bf16.mxu0 %v935_v13 }
  0x8c   :  { %809 = vmatpush3.bf16.msra.mxu0 %v936_v14 }
  0x8d   :  { %810 = vmatprep.subr.bf16.mxu0 %v937_v15 }
  0x90   :  { %811 = vmatpush3.bf16.msra.mxu0 %v938_v24 }
  0x91   :  { %812 = vmatprep.subr.bf16.mxu0 %v939_v25 }
  0x94   :  { %813 = vmatpush3.bf16.msra.mxu0 %v940_v26 }
 0x14a   :  { %v293_v16 = vpop.f32.mrb[0].mxu0 }
 0x14b   :  { %v300_v17 = vmax.f32 %v293_v16, 0.0  ;;  %v295_v18 = vpop.f32.mrb[1].mxu0 }
 0x14c   :  { %v297_v19 = vpop.f32.mrb[2].mxu0  ;;  %v301_v20 = vmax.f32 %v295_v18, 0.0 }
 0x14d   :  { %v298_v21 = vpop.f32.mrb[3].mxu0  ;;  %v302_v23 = vpack.c.bf16 %v300_v17, %v300_v17 }
 0x14e   :  { %v303_v22 = vpack.c.bf16 %v301_v20, %v301_v20 }
 0x150   :  { %528 = vmatprep.mubr.bf16.mxu1 %v303_v22 }
 0x151   :  { %529 = vmatmul.mubr.bf16.vlgmr.msra.gmra.mrb[0].mxu1 %v302_v23 }
 0x224   :  { %v530_v27 = vpop.f32.mrb[0].mxu1 }
 0x225   :  { %v537_v28 = vmax.f32 %v530_v27, 0.0  ;;  %v532_v29 = vpop.f32.mrb[1].mxu1 }
 0x226   :  { %v538_v30 = vmax.f32 %v532_v29, 0.0  ;;  %v534_v31 = vpop.f32.mrb[2].mxu1 }
 0x227   :  { %v535_v32 = vpop.f32.mrb[3].mxu1  ;;  %v539_v34 = vpack.c.bf16 %v537_v28, %v537_v28 }
 0x228   :  { %v540_v33 = vpack.c.bf16 %v538_v30, %v538_v30 }
 0x22a   :  { %701 = vmatprep.mubr.bf16.mxu0 %v540_v33 }
 0x22b   :  { %702 = vmatmul.mubr.bf16.vlgmr.msra.gmra.mrb[4].mxu0 %v539_v34 }
 0x2fe   :  { %v814_v35 = vpop.f32.mrb[4].mxu0 }
 0x2ff   :  { %v815_v36 = vpop.f32.mrb[5].mxu0 }
 0x300   :  { %v816_v37 = vadd.f32 %v815_v36, %v814_v35  ;;  %v817_v38 = vpop.f32.mrb[6].mxu0 }
 0x301   :  { %v818_v39 = vpop.f32.mrb[7].mxu0 }
 0x302   :  { %709 = vst [vmem:[%s1102_s4] sm:$0xff] %v816_v37 }
 0x303   :  { %714 = vsyncpa [#allocation3], 1 }
 0x304   :  { %715 = vsyncpa [#allocation5], 1 }

</bundles_post_ra>
